<compile_context>
chip_gen: v7x
topology: tpu7x:2x2x1
jax: 0.10.0
libtpu: 0.0.40
codegen_flags: <defaults>
</compile_context>

<pallas_src>
import jax
import jax.numpy as jnp
from jax.experimental import pallas as pl
from jax.experimental.pallas import tpu as pltpu


def _time_add_kernel(x_ref, t_ref, o_ref):
    """out = x + time, with time an (rows, 1) column lane-broadcast over features."""
    o_ref[...] = (x_ref[...].astype(jnp.float32) + t_ref[...]).astype(o_ref.dtype)


def time_encoding(x, mask, lengths):
    """x: (F, B, D) (seq-first); mask: (B, F) bool; lengths: (B,) int.

    Returns (F, B, D) in x.dtype, matching TimeEncoding.forward in eval mode.
    """
    F, B, D = x.shape
    dtype = x.dtype

    # time[j, b] = j * mask[b, j] / (lengths[b] - 1)  -- O(F*B), computed once
    # in the wrapper (NaN/inf behavior for lengths<=1 mirrors the PyTorch 0/0).
    inv_len = 1.0 / (lengths.astype(jnp.float32) - 1.0)                 # (B,)
    time = (jnp.arange(F, dtype=jnp.float32)[:, None]
            * mask.astype(jnp.float32).T
            * inv_len[None, :])                                         # (F, B)

    total = F * B
    x_flat = x.reshape(total, D)            # free reshape: trailing dims contiguous
    t_flat = time.reshape(total, 1)         # row r = f*B + b matches x_flat rows

    # Row tile: multiple of 8, <= 1024 rows, and <= ~half the rows so the
    # parallel grid has >=2 steps (megacore on v7x). Partial last tile is fine
    # (out-of-bounds writes are masked).
    if total <= 8:
        rows = total
    else:
        rows = min(1024, ((total + 1) // 2 + 7) // 8 * 8)
    grid = (pl.cdiv(total, rows),)

    out_flat = pl.pallas_call(
        _time_add_kernel,
        out_shape=jax.ShapeDtypeStruct((total, D), dtype),
        grid_spec=pltpu.PrefetchScalarGridSpec(
            num_scalar_prefetch=0,
            grid=grid,
            in_specs=[pl.BlockSpec((rows, D), lambda i: (i, 0)),
                      pl.BlockSpec((rows, 1), lambda i: (i, 0))],
            out_specs=pl.BlockSpec((rows, D), lambda i: (i, 0)),
        ),
        compiler_params=pltpu.CompilerParams(
            dimension_semantics=("parallel",)),
    )(x_flat, t_flat)

    return out_flat.reshape(F, B, D)


# TODO(synk): nn.Dropout(p=0.1) is identity in eval mode; training-mode
# stochastic dropout (pltpu.prng_seed / prng_random_bits) is intentionally
# not implemented here.


if __name__ == "__main__":
    key = jax.random.PRNGKey(0)

    nframes, bs, d_model = 8, 2, 384                     # seq-first, as the module expects
    x = jax.random.normal(key, (nframes, bs, d_model), jnp.float32)
    lengths = jnp.array([nframes, nframes - 2], dtype=jnp.int32)
    mask = jnp.arange(nframes, dtype=jnp.int32)[None, :] < lengths[:, None]   # (bs, F) bool

    out = jax.jit(time_encoding)(x, mask, lengths)
    jax.block_until_ready(out)

    # Pure-JAX reference of the PyTorch forward (eval mode).
    t = mask.astype(jnp.float32) / (lengths.astype(jnp.float32)[:, None] - 1.0)   # (bs, F)
    t = t * jnp.arange(nframes, dtype=jnp.float32)[None, :]                       # (bs, F)
    ref = x + t.T[:, :, None]                                                     # (F, bs, D)

    assert out.shape == (nframes, bs, d_model)
    assert out.dtype == x.dtype
    assert bool(jnp.allclose(out, ref, atol=1e-5, rtol=1e-5))
    print("KERNEL_OK")
</pallas_src>

<mosaic_0001>
module attributes {stable_mosaic.version = 11 : i64} {
  func.func @_time_add_kernel(%arg0: i32, %arg1: memref<8x384xf32, #tpu.memory_space<vmem>>, %arg2: memref<8x1xf32, #tpu.memory_space<vmem>>, %arg3: memref<8x384xf32, #tpu.memory_space<vmem>>) attributes {dimension_semantics = [#tpu.dimension_semantics<parallel>], iteration_bounds = array<i64: 2>, scalar_prefetch = 0 : i64, scratch_operands = 0 : i64, tpu.core_type = #tpu.core_type<tc>, window_params = [{transform_indices = @transform_0, window_bounds = array<i64: 8, 384>}, {transform_indices = @transform_1, window_bounds = array<i64: 8, 1>}, {transform_indices = @transform_2, window_bounds = array<i64: 8, 384>}]} {
    %c0 = arith.constant 0 : index
    %c0_0 = arith.constant 0 : index
    %0 = vector.load %arg1[%c0, %c0_0] : memref<8x384xf32, #tpu.memory_space<vmem>>, vector<8x384xf32>
    %c0_1 = arith.constant 0 : index
    %c0_2 = arith.constant 0 : index
    %1 = vector.load %arg2[%c0_1, %c0_2] : memref<8x1xf32, #tpu.memory_space<vmem>>, vector<8x1xf32>
    %2 = vector.broadcast %1 : vector<8x1xf32> to vector<8x384xf32>
    %3 = arith.addf %0, %2 : vector<8x384xf32>
    %c0_3 = arith.constant 0 : index
    %c0_4 = arith.constant 0 : index
    %4 = vector.load %arg3[%c0_3, %c0_4] : memref<8x384xf32, #tpu.memory_space<vmem>>, vector<8x384xf32>
    tpu.vector_store %arg3[%c0_3, %c0_4], %3 {strides = array<i32>} : memref<8x384xf32, #tpu.memory_space<vmem>>, vector<8x384xf32>,
    return
  }
  func.func @transform_0(%arg0: i32) -> (i32, i32) {
    %c0_i32 = arith.constant 0 : i32
    %c0_i32_0 = arith.constant 0 : i32
    return %arg0, %c0_i32 : i32, i32
  }
  func.func @transform_1(%arg0: i32) -> (i32, i32) {
    %c0_i32 = arith.constant 0 : i32
    %c0_i32_0 = arith.constant 0 : i32
    return %arg0, %c0_i32 : i32, i32
  }
  func.func @transform_2(%arg0: i32) -> (i32, i32) {
    %c0_i32 = arith.constant 0 : i32
    %c0_i32_0 = arith.constant 0 : i32
    return %arg0, %c0_i32 : i32, i32
  }
}

</mosaic_0001>

<bundles_post_ra>
// kernel: time_encoding.1
= control target key start
LH: loop header
LB: loop body
LE: loop exit
PB: predicated region body
PF: predicated region fallthrough
CT: control target
= control target key end

     0   :  { %s288_s9 = smov 0   ;;  %s308_s0 = inlined_call_operand.vmem [shape: f32[16,384], index: 0, kind: input, shape index: {}]   ;;  %s309_s1 = inlined_call_operand.vmem [shape: f32[16,1], index: 1, kind: input, shape index: {}]   ;;  %s310_s2 = inlined_call_operand.vmem [shape: f32[16,384], index: 2, kind: output, shape index: {}]  }
   0x1 LB: > { %s243_s10 = sadd.s32 4294967295, %s270_s9   ;;  %p247_p0 = scmp.ge.s32.totalorder %s270_s9, 1  ;;  %s270_s9 = sphi %s288_s9, %s12_s9  }
   0x2   : > { %p121_p1 = scmp.lt.s32.totalorder %s270_s9, 3 }
   0x4   : > { %p122_p2 = pnand %p247_p0, %p121_p1 }
   0x5   : > { %p147_p3 = scmp.lt.s32.totalorder (!%p122_p2), %s243_s10, 1  ;;  %v272_v0 = vmov (!%p122_p2), 0  }
   0x6   : > { %125 = sbr.rel (%p122_p2) target bundleno = 149 (0x95), region = 28  ;;  %263 = vset.pattern.permute.xlu0 (!%p122_p2), %v272_v0 }
   0xd   : > { %s312_s10 = smov (!%p147_p3, %s243_s10), 1 }
   0xe   : > { %s249_s11 = sshll.u32 %s312_s10, 3  ;;  %s253_s15 = smul.u32 24, %s312_s10 }
   0xf   : > { %s155_s14 = scalar_lea.vmem %s309_s1, %s249_s11 }
  0x10   : > { %v164_v1 = vld [vmem:[%s155_s14] sm:$0xff]  ;;  %s151_s18 = scalar_lea.vmem %s308_s0, %s253_s15  ;;  %s160_s21 = scalar_lea.vmem %s310_s2, %s253_s15 }
  0x11   : > { %167 = vperm.xlu0 %263, %v164_v1   ;;  %v161_v2 = vld [vmem:[%s151_s18] sm:$0xff]  ;;  %v162_v3 = vld [vmem:[%s151_s18 + $0x8] sm:$0xff]  ;;  %v163_v4 = vld [vmem:[%s151_s18 + $0x10] sm:$0xff] }
  0x90   : > { %v168_v5 = vpop.permute.xlu0 %167 }
  0x91   : > { %v170_v6 = vadd.f32 %v168_v5, %v161_v2  ;;  %v171_v7 = vadd.f32 %v168_v5, %v162_v3  ;;  %v172_v8 = vadd.f32 %v168_v5, %v163_v4 }
  0x93   : > { %173 = vst [vmem:[%s160_s21] sm:$0xff] %v170_v6  ;;  %174 = vst [vmem:[%s160_s21 + $0x8] sm:$0xff] %v171_v7 }
  0x94   : > { %175 = vst [vmem:[%s160_s21 + $0x10] sm:$0xff] %v172_v8 }
  0x95 PF: > { %s12_s9 = sadd.s32 1, %s270_s9  }
  0x96   : > { %p9_p4 = scmp.ge.s32.totalorder %s12_s9, 4  }
  0x98   :  { %11 = sbr.rel (!%p9_p4) target bundleno = 1 (0x1), region = 61 }

</bundles_post_ra>
